<compile_context>
chip_gen: v7x
topology: tpu7x:2x2x1
jax: 0.10.0
libtpu: 0.0.40
codegen_flags: <defaults>
</compile_context>

<pallas_src>
import jax
import jax.numpy as jnp
from jax.experimental import pallas as pl
from jax.experimental.pallas import tpu as pltpu


def _copy_kernel(x_ref, o_ref):
    # Pure lane-dense passthrough copy of a full (B, seq_tile, 768) tile.
    # No in-kernel reshape, no masked partial stores.
    o_ref[...] = x_ref[...]


def view_as_heads(x, num_heads, head_dim, *, seq_tile=128):
    B, S, H = x.shape
    assert H == num_heads * head_dim
    assert S % seq_tile == 0
    assert H % 128 == 0 and seq_tile % 8 == 0  # lane/sublane alignment

    # Lane-dense, S-tiled identity copy through VMEM (fusion-site placeholder).
    # In production, delete this pallas_call entirely — torch .view on
    # contiguous data is metadata-only, i.e. just the reshape below.
    y = pl.pallas_call(
        _copy_kernel,
        out_shape=jax.ShapeDtypeStruct((B, S, H), x.dtype),
        grid_spec=pltpu.PrefetchScalarGridSpec(
            num_scalar_prefetch=0,
            grid=(S // seq_tile,),
            in_specs=[pl.BlockSpec((B, seq_tile, H), lambda i: (0, i, 0))],
            out_specs=pl.BlockSpec((B, seq_tile, H), lambda i: (0, i, 0)),
        ),
        compiler_params=pltpu.CompilerParams(
            dimension_semantics=("parallel",),
        ),
    )(x)

    # Free (metadata-only) reshape in the wrapper — this is the actual .view.
    return y.reshape(B, S, num_heads, head_dim)


if __name__ == "__main__":
    key = jax.random.PRNGKey(0)
    # Shapes implied by the module: x401 is (1, 384, 768), target view (1, 384, 12, 64).
    B, S, H = 1, 384, 768
    num_heads, head_dim = 12, 64

    x401 = jax.random.normal(key, (B, S, H), dtype=jnp.float32)
    x410 = (B, S, num_heads, head_dim)

    x411 = view_as_heads(x401, num_heads, head_dim)
    x411 = jax.block_until_ready(x411)

    # Correctness check against the pure-JAX reference (reshape == torch .view here).
    ref = x401.reshape(x410)
    assert x411.shape == x410
    assert x411.dtype == x401.dtype
    assert bool(jnp.array_equal(x411, ref))

    print("KERNEL_OK")
</pallas_src>

<mosaic_0001>
module attributes {stable_mosaic.version = 11 : i64} {
  func.func @_copy_kernel(%arg0: i32, %arg1: memref<1x128x768xf32, #tpu.memory_space<vmem>>, %arg2: memref<1x128x768xf32, #tpu.memory_space<vmem>>) attributes {dimension_semantics = [#tpu.dimension_semantics<parallel>], iteration_bounds = array<i64: 3>, scalar_prefetch = 0 : i64, scratch_operands = 0 : i64, tpu.core_type = #tpu.core_type<tc>, window_params = [{transform_indices = @transform_0, window_bounds = array<i64: 1, 128, 768>}, {transform_indices = @transform_1, window_bounds = array<i64: 1, 128, 768>}]} {
    %c0 = arith.constant 0 : index
    %c0_0 = arith.constant 0 : index
    %c0_1 = arith.constant 0 : index
    %0 = vector.load %arg1[%c0, %c0_0, %c0_1] : memref<1x128x768xf32, #tpu.memory_space<vmem>>, vector<1x128x768xf32>
    %c0_2 = arith.constant 0 : index
    %c0_3 = arith.constant 0 : index
    %c0_4 = arith.constant 0 : index
    %1 = vector.load %arg2[%c0_2, %c0_3, %c0_4] : memref<1x128x768xf32, #tpu.memory_space<vmem>>, vector<1x128x768xf32>
    tpu.vector_store %arg2[%c0_2, %c0_3, %c0_4], %0 {strides = array<i32>} : memref<1x128x768xf32, #tpu.memory_space<vmem>>, vector<1x128x768xf32>,
    return
  }
  func.func @transform_0(%arg0: i32) -> (i32, i32, i32) {
    %c0_i32 = arith.constant 0 : i32
    %c0_i32_0 = arith.constant 0 : i32
    %c0_i32_1 = arith.constant 0 : i32
    return %c0_i32, %arg0, %c0_i32_0 : i32, i32, i32
  }
  func.func @transform_1(%arg0: i32) -> (i32, i32, i32) {
    %c0_i32 = arith.constant 0 : i32
    %c0_i32_0 = arith.constant 0 : i32
    %c0_i32_1 = arith.constant 0 : i32
    return %c0_i32, %arg0, %c0_i32_0 : i32, i32, i32
  }
}

</mosaic_0001>

<bundles_post_ra>
// kernel: tpu_custom_call.1
= control target key start
LH: loop header
LB: loop body
LE: loop exit
PB: predicated region body
PF: predicated region fallthrough
CT: control target
= control target key end

     0   :  { %6 = vsyncpa [#allocation3], 0  ;;  %s949_s0 = inlined_call_operand.hbm [shape: f32[1,384,768], index: 0, kind: input, shape index: {}]   ;;  %s950_s1 = inlined_call_operand.hbm [shape: f32[1,384,768], index: 1, kind: output, shape index: {}]  }
   0x1   :  { %8 = vsyncpa [#allocation3 + $0x1], 0 }
   0x2   :  { %9 = vsyncpa [#allocation4], 0 }
   0x3   :  { %11 = vsyncpa [#allocation4 + $0x1], 0  ;;  %s598_s6 = smov 0   ;;  %s600_s7 = smov 0  }
   0x4   :  { %s602_s8 = smov 0   ;;  %s604_s9 = smov 0  }
   0x5 LB: > { %s619_s10 = sadd.s32 4294967295, %s580_s9   ;;  %s418_s11 = sadd.s32 4294967294, %s580_s9   ;;  %s580_s9 = sphi %s604_s9, %s961_s9   ;;  %s576_s8 = sphi %s602_s8, %s960_s8   ;;  %s572_s7 = sphi %s600_s7, %s959_s7   ;;  %s568_s6 = sphi %s598_s6, %s958_s6  }
   0x6   : > { %s623_s12 = sadd.s32 1, %s580_s9   ;;  %s24_s13 = sadd.s32 1, %s576_s8 }
   0x7   : > { %s21_s14 = ssub.s32 %s580_s9, %s623_s12  ;;  %p31_p0 = scmp.ne.s32.totalorder %s576_s8, %s572_s7 }
   0x8   : > { %p22_p1 = scmp.eq.s32.totalorder %s21_s14, 0  ;;  %p32_p2 = scmp.eq.s32.totalorder %s580_s9, 0 }
   0x9   : > { %p37_p3 = scmp.ne.s32.totalorder %s572_s7, %s568_s6  ;;  %p38_p4 = scmp.eq.s32.totalorder %s619_s10, 0 }
   0xa   : > { %s635_s15 = scalar_select %p22_p1, %s576_s8, %s24_s13  }
   0xb   : > { %p33_p5 = por %p32_p2, %p31_p0  ;;  %p637_p6 = por %p38_p4, %p37_p3 }
   0xc   : > { %p61_p7 = scmp.eq.s32.totalorder %s619_s10, 2  ;;  %p67_p8 = scmp.eq.s32.totalorder %s418_s11, 2 }
   0xd   : > { %p446_p9 = scmp.lt.s32.totalorder %s580_s9, 3  ;;  %s87_s19 = sand.u32 1, %s576_s8  }
   0xe   : > { %p643_p10 = por %p61_p7, %p31_p0  ;;  %p647_p11 = por %p67_p8, %p37_p3 }
   0xf   : > { %s431_s20 = smul.u32 12288, %s580_s9  ;;  %p658_p12 = pnand %p446_p9, %p33_p5 }
  0x10   : > { %s953_s17 = scalar_select %p643_p10, 1, 0 }
  0x11   : > { %s954_s18 = scalar_select %p647_p11, 1, 0 }
  0x12   : > { %s430_s21 = smul.u32 768, %s87_s19  ;;  %s656_s24 = scalar_lea.hbm %s949_s0, %s431_s20 }
  0x13   : > { %s664_s28 = scalar_lea.sflag [#allocation3], %s87_s19  ;;  %s484_s29 = scalar_lea.hbm %s656_s24, 12288 }
  0x14   : > { %s91_s26 = scalar_lea.vmem [#allocation2], %s430_s21  ;;  %p485_p13 = scmp.ne.s32.totalorder %s656_s24, %s484_s29 }
  0x15   : > { %s99_s27 = sshll.u32 %s91_s26, 4  ;;  %p486_p0 = pneg %p658_p12  ;;  %s662_s27 = int_to_ptr.vmem [resolvable:$true] %s99_s27 }
  0x16   : > { %s489_s3 = scalar_lea.hbm %s949_s0, 36864  ;;  %p490_p3 = scmp.lt.u32.totalorder %s656_s24, %s949_s0 }
  0x17   : > { %p487_p1 = pnand %p486_p0, %p485_p13  ;;  %p491_p4 = scmp.lt.u32.totalorder %s489_s3, %s484_s29 }
  0x18   : > { %p493_p7 = scmp.lt.u32.totalorder %s484_s29, %s656_s24 }
  0x19   : > { %p488_p2 = pneg %p487_p1  ;;  %p492_p5 = por %p491_p4, %p490_p3 }
  0x1b   : > { %p494_p8 = por %p493_p7, %p492_p5 }
  0x1d   : > { %p495_p9 = pnand %p494_p8, %p488_p2 }
  0x1f   : > { %498 = shalt.err (!%p495_p9)
}
  0x20   : > { %s499_s11 = scalar_lea.vmem %s662_s27, 12288  ;;  %s582_s13 = smov [#allocation2]  }
  0x21   : > { %p500_p13 = scmp.ne.s32.totalorder %s662_s27, %s499_s11  ;;  %s504_s14 = sshll.u32 %s582_s13, 4  ;;  %s505_s14 = int_to_ptr.vmem [resolvable:$false] %s504_s14 }
  0x22   : > { %s506_s19 = scalar_lea.vmem %s505_s14, 24576  ;;  %p507_p10 = scmp.lt.s32.totalorder %s662_s27, %s505_s14 }
  0x23   : > { %p502_p1 = pnand %p500_p13, %p486_p0  ;;  %p508_p3 = scmp.lt.s32.totalorder %s506_s19, %s499_s11 }
  0x25   : > { %p503_p11 = pneg %p502_p1  ;;  %p509_p4 = por %p508_p3, %p507_p10 }
  0x27   : > { %p510_p5 = pnand %p509_p4, %p503_p11 }
  0x29   : > { %513 = shalt.err (!%p510_p5)
}
  0x2a   : > { %s583_s20 = smov 768   ;;  %s584_s21 = smov 48  }
  0x2b   : > { %441 = dma.hbm_to_vmem [thread:$0]  (!%p658_p12), %s656_s24, 12288, %s662_s27, %s664_s28, %s583_s20, %s583_s20, %s584_s21  }
  0x2c   : > { %p424_p0 = scmp.ge.s32.totalorder %s580_s9, 1  ;;  %p107_p2 = scmp.lt.s32.totalorder %s580_s9, 4 }
  0x2e   : > { %p108_p7 = pnand %p424_p0, %p107_p2 }
  0x2f   : > { %s695_s22 = sand.u32 (!%p108_p7), 1, %s572_s7  }
  0x30   : > { %111 = sbr.rel (%p108_p7) target bundleno = 119 (0x77), region = 24  ;;  %s114_s26 = scalar_lea.sflag (!%p108_p7), [#allocation3], %s695_s22 }
  0x31   : > { %s432_s23 = smul.u32 (!%p108_p7), 768, %s695_s22 }
  0x33   : > { %s699_s29 = scalar_lea.vmem (!%p108_p7), [#allocation2], %s432_s23 }
  0x37   : > { %559 = dma.done.wait (%p637_p6), %s114_s26, 12288  }
  0x38   : > { %561 = vsyncadd (%p637_p6), %s114_s26, 4294955008  ;;  %v138_v0 = vld [vmem:[%s699_s29] sm:$0xff]  ;;  %v139_v1 = vld [vmem:[%s699_s29 + $0x8] sm:$0xff]  ;;  %s708_s24 = scalar_lea.vmem [#allocation5], %s432_s23  ;;  %s433_s16 = smul.u32 12288, %s619_s10 }
  0x39   : > { %v140_v2 = vld [vmem:[%s699_s29 + $0x10] sm:$0xff]  ;;  %234 = vst [vmem:[%s708_s24] sm:$0xff] %v138_v0  ;;  %235 = vst [vmem:[%s708_s24 + $0x8] sm:$0xff] %v139_v1  ;;  %v141_v3 = vld [vmem:[%s699_s29 + $0x18] sm:$0xff]  ;;  %s345_s25 = sshll.u32 %s708_s24, 4  ;;  %s331_s30 = scalar_lea.sflag [#allocation4], %s695_s22  ;;  %s886_s25 = int_to_ptr.vmem [resolvable:$true] %s345_s25 }
  0x3a   : > { %236 = vst [vmem:[%s708_s24 + $0x10] sm:$0xff] %v140_v2  ;;  %v142_v4 = vld [vmem:[%s699_s29 + $0x20] sm:$0xff]  ;;  %v143_v5 = vld [vmem:[%s699_s29 + $0x28] sm:$0xff]  ;;  %237 = vst [vmem:[%s708_s24 + $0x18] sm:$0xff] %v141_v3  ;;  %s897_s28 = scalar_lea.hbm %s950_s1, %s433_s16  ;;  %s514_s2 = scalar_lea.vmem %s886_s25, 12288 }
  0x3b   : > { %238 = vst [vmem:[%s708_s24 + $0x20] sm:$0xff] %v142_v4  ;;  %239 = vst [vmem:[%s708_s24 + $0x28] sm:$0xff] %v143_v5  ;;  %v144_v6 = vld [vmem:[%s699_s29 + $0x30] sm:$0xff]  ;;  %v145_v7 = vld [vmem:[%s699_s29 + $0x38] sm:$0xff]  ;;  %p515_p6 = scmp.ne.s32.totalorder %s886_s25, %s514_s2  ;;  %p956_p10 = scmp.ne.s32.totalorder %s953_s17, 0 }
  0x3c   : > { %v146_v8 = vld [vmem:[%s699_s29 + $0x40] sm:$0xff]  ;;  %240 = vst [vmem:[%s708_s24 + $0x30] sm:$0xff] %v144_v6  ;;  %241 = vst [vmem:[%s708_s24 + $0x38] sm:$0xff] %v145_v7  ;;  %v147_v9 = vld [vmem:[%s699_s29 + $0x48] sm:$0xff]  ;;  %s585_s3 = smov [#allocation5]  }
  0x3d   : > { %242 = vst [vmem:[%s708_s24 + $0x40] sm:$0xff] %v146_v8  ;;  %v148_v10 = vld [vmem:[%s699_s29 + $0x50] sm:$0xff]  ;;  %v149_v11 = vld [vmem:[%s699_s29 + $0x58] sm:$0xff]  ;;  %243 = vst [vmem:[%s708_s24 + $0x48] sm:$0xff] %v147_v9  ;;  %p516_p11 = pnand %p515_p6, %p956_p10  ;;  %s518_s4 = sshll.u32 %s585_s3, 4  ;;  %s519_s4 = int_to_ptr.vmem [resolvable:$false] %s518_s4 }
  0x3e   : > { %244 = vst [vmem:[%s708_s24 + $0x50] sm:$0xff] %v148_v10  ;;  %245 = vst [vmem:[%s708_s24 + $0x58] sm:$0xff] %v149_v11  ;;  %v150_v12 = vld [vmem:[%s699_s29 + $0x60] sm:$0xff]  ;;  %v151_v13 = vld [vmem:[%s699_s29 + $0x68] sm:$0xff]  ;;  %s520_s5 = scalar_lea.vmem %s519_s4, 24576  ;;  %p521_p8 = scmp.lt.s32.totalorder %s886_s25, %s519_s4 }
  0x3f   : > { %v152_v14 = vld [vmem:[%s699_s29 + $0x70] sm:$0xff]  ;;  %246 = vst [vmem:[%s708_s24 + $0x60] sm:$0xff] %v150_v12  ;;  %247 = vst [vmem:[%s708_s24 + $0x68] sm:$0xff] %v151_v13  ;;  %v153_v15 = vld [vmem:[%s699_s29 + $0x78] sm:$0xff]  ;;  %p517_p12 = pneg %p516_p11  ;;  %p522_p9 = scmp.lt.s32.totalorder %s520_s5, %s514_s2 }
  0x40   : > { %248 = vst [vmem:[%s708_s24 + $0x70] sm:$0xff] %v152_v14  ;;  %v154_v16 = vld [vmem:[%s699_s29 + $0x80] sm:$0xff]  ;;  %v155_v17 = vld [vmem:[%s699_s29 + $0x88] sm:$0xff]  ;;  %249 = vst [vmem:[%s708_s24 + $0x78] sm:$0xff] %v153_v15 }
  0x41   : > { %250 = vst [vmem:[%s708_s24 + $0x80] sm:$0xff] %v154_v16  ;;  %251 = vst [vmem:[%s708_s24 + $0x88] sm:$0xff] %v155_v17  ;;  %v156_v18 = vld [vmem:[%s699_s29 + $0x90] sm:$0xff]  ;;  %v157_v19 = vld [vmem:[%s699_s29 + $0x98] sm:$0xff]  ;;  %p523_p13 = por %p522_p9, %p521_p8 }
  0x42   : > { %v158_v20 = vld [vmem:[%s699_s29 + $0xa0] sm:$0xff]  ;;  %252 = vst [vmem:[%s708_s24 + $0x90] sm:$0xff] %v156_v18  ;;  %253 = vst [vmem:[%s708_s24 + $0x98] sm:$0xff] %v157_v19  ;;  %v159_v21 = vld [vmem:[%s699_s29 + $0xa8] sm:$0xff] }
  0x43   : > { %254 = vst [vmem:[%s708_s24 + $0xa0] sm:$0xff] %v158_v20  ;;  %v160_v22 = vld [vmem:[%s699_s29 + $0xb0] sm:$0xff]  ;;  %v161_v23 = vld [vmem:[%s699_s29 + $0xb8] sm:$0xff]  ;;  %255 = vst [vmem:[%s708_s24 + $0xa8] sm:$0xff] %v159_v21  ;;  %p524_p1 = pnand %p523_p13, %p517_p12 }
  0x44   : > { %256 = vst [vmem:[%s708_s24 + $0xb0] sm:$0xff] %v160_v22  ;;  %257 = vst [vmem:[%s708_s24 + $0xb8] sm:$0xff] %v161_v23  ;;  %v162_v24 = vld [vmem:[%s699_s29 + $0xc0] sm:$0xff]  ;;  %v163_v25 = vld [vmem:[%s699_s29 + $0xc8] sm:$0xff] }
  0x45   : > { %v164_v26 = vld [vmem:[%s699_s29 + $0xd0] sm:$0xff]  ;;  %258 = vst [vmem:[%s708_s24 + $0xc0] sm:$0xff] %v162_v24  ;;  %259 = vst [vmem:[%s708_s24 + $0xc8] sm:$0xff] %v163_v25  ;;  %v165_v27 = vld [vmem:[%s699_s29 + $0xd8] sm:$0xff] }
  0x46   : > { %260 = vst [vmem:[%s708_s24 + $0xd0] sm:$0xff] %v164_v26  ;;  %v166_v28 = vld [vmem:[%s699_s29 + $0xe0] sm:$0xff]  ;;  %v167_v29 = vld [vmem:[%s699_s29 + $0xe8] sm:$0xff]  ;;  %261 = vst [vmem:[%s708_s24 + $0xd8] sm:$0xff] %v165_v27 }
  0x47   : > { %262 = vst [vmem:[%s708_s24 + $0xe0] sm:$0xff] %v166_v28  ;;  %263 = vst [vmem:[%s708_s24 + $0xe8] sm:$0xff] %v167_v29  ;;  %v168_v30 = vld [vmem:[%s699_s29 + $0xf0] sm:$0xff]  ;;  %v169_v31 = vld [vmem:[%s699_s29 + $0xf8] sm:$0xff] }
  0x48   : > { %v170_v32 = vld [vmem:[%s699_s29 + $0x100] sm:$0xff]  ;;  %264 = vst [vmem:[%s708_s24 + $0xf0] sm:$0xff] %v168_v30  ;;  %265 = vst [vmem:[%s708_s24 + $0xf8] sm:$0xff] %v169_v31  ;;  %v171_v33 = vld [vmem:[%s699_s29 + $0x108] sm:$0xff] }
  0x49   : > { %266 = vst [vmem:[%s708_s24 + $0x100] sm:$0xff] %v170_v32  ;;  %v172_v34 = vld [vmem:[%s699_s29 + $0x110] sm:$0xff]  ;;  %v173_v35 = vld [vmem:[%s699_s29 + $0x118] sm:$0xff]  ;;  %267 = vst [vmem:[%s708_s24 + $0x108] sm:$0xff] %v171_v33 }
  0x4a   : > { %268 = vst [vmem:[%s708_s24 + $0x110] sm:$0xff] %v172_v34  ;;  %269 = vst [vmem:[%s708_s24 + $0x118] sm:$0xff] %v173_v35  ;;  %v174_v36 = vld [vmem:[%s699_s29 + $0x120] sm:$0xff]  ;;  %v175_v37 = vld [vmem:[%s699_s29 + $0x128] sm:$0xff] }
  0x4b   : > { %v176_v38 = vld [vmem:[%s699_s29 + $0x130] sm:$0xff]  ;;  %270 = vst [vmem:[%s708_s24 + $0x120] sm:$0xff] %v174_v36  ;;  %271 = vst [vmem:[%s708_s24 + $0x128] sm:$0xff] %v175_v37  ;;  %v177_v39 = vld [vmem:[%s699_s29 + $0x138] sm:$0xff] }
  0x4c   : > { %272 = vst [vmem:[%s708_s24 + $0x130] sm:$0xff] %v176_v38  ;;  %v178_v40 = vld [vmem:[%s699_s29 + $0x140] sm:$0xff]  ;;  %v179_v41 = vld [vmem:[%s699_s29 + $0x148] sm:$0xff]  ;;  %273 = vst [vmem:[%s708_s24 + $0x138] sm:$0xff] %v177_v39 }
  0x4d   : > { %274 = vst [vmem:[%s708_s24 + $0x140] sm:$0xff] %v178_v40  ;;  %275 = vst [vmem:[%s708_s24 + $0x148] sm:$0xff] %v179_v41  ;;  %v180_v42 = vld [vmem:[%s699_s29 + $0x150] sm:$0xff]  ;;  %v181_v43 = vld [vmem:[%s699_s29 + $0x158] sm:$0xff] }
  0x4e   : > { %v182_v44 = vld [vmem:[%s699_s29 + $0x160] sm:$0xff]  ;;  %276 = vst [vmem:[%s708_s24 + $0x150] sm:$0xff] %v180_v42  ;;  %277 = vst [vmem:[%s708_s24 + $0x158] sm:$0xff] %v181_v43  ;;  %v183_v45 = vld [vmem:[%s699_s29 + $0x168] sm:$0xff] }
  0x4f   : > { %278 = vst [vmem:[%s708_s24 + $0x160] sm:$0xff] %v182_v44  ;;  %v184_v46 = vld [vmem:[%s699_s29 + $0x170] sm:$0xff]  ;;  %v185_v47 = vld [vmem:[%s699_s29 + $0x178] sm:$0xff]  ;;  %279 = vst [vmem:[%s708_s24 + $0x168] sm:$0xff] %v183_v45 }
  0x50   : > { %280 = vst [vmem:[%s708_s24 + $0x170] sm:$0xff] %v184_v46  ;;  %281 = vst [vmem:[%s708_s24 + $0x178] sm:$0xff] %v185_v47  ;;  %v186_v48 = vld [vmem:[%s699_s29 + $0x180] sm:$0xff]  ;;  %v187_v49 = vld [vmem:[%s699_s29 + $0x188] sm:$0xff] }
  0x51   : > { %v188_v50 = vld [vmem:[%s699_s29 + $0x190] sm:$0xff]  ;;  %282 = vst [vmem:[%s708_s24 + $0x180] sm:$0xff] %v186_v48  ;;  %283 = vst [vmem:[%s708_s24 + $0x188] sm:$0xff] %v187_v49  ;;  %v189_v51 = vld [vmem:[%s699_s29 + $0x198] sm:$0xff] }
  0x52   : > { %284 = vst [vmem:[%s708_s24 + $0x190] sm:$0xff] %v188_v50  ;;  %v190_v52 = vld [vmem:[%s699_s29 + $0x1a0] sm:$0xff]  ;;  %v191_v53 = vld [vmem:[%s699_s29 + $0x1a8] sm:$0xff]  ;;  %285 = vst [vmem:[%s708_s24 + $0x198] sm:$0xff] %v189_v51 }
  0x53   : > { %286 = vst [vmem:[%s708_s24 + $0x1a0] sm:$0xff] %v190_v52  ;;  %287 = vst [vmem:[%s708_s24 + $0x1a8] sm:$0xff] %v191_v53  ;;  %v192_v54 = vld [vmem:[%s699_s29 + $0x1b0] sm:$0xff]  ;;  %v193_v55 = vld [vmem:[%s699_s29 + $0x1b8] sm:$0xff] }
  0x54   : > { %v194_v56 = vld [vmem:[%s699_s29 + $0x1c0] sm:$0xff]  ;;  %288 = vst [vmem:[%s708_s24 + $0x1b0] sm:$0xff] %v192_v54  ;;  %289 = vst [vmem:[%s708_s24 + $0x1b8] sm:$0xff] %v193_v55  ;;  %v195_v57 = vld [vmem:[%s699_s29 + $0x1c8] sm:$0xff] }
  0x55   : > { %290 = vst [vmem:[%s708_s24 + $0x1c0] sm:$0xff] %v194_v56  ;;  %v196_v58 = vld [vmem:[%s699_s29 + $0x1d0] sm:$0xff]  ;;  %v197_v59 = vld [vmem:[%s699_s29 + $0x1d8] sm:$0xff]  ;;  %291 = vst [vmem:[%s708_s24 + $0x1c8] sm:$0xff] %v195_v57 }
  0x56   : > { %292 = vst [vmem:[%s708_s24 + $0x1d0] sm:$0xff] %v196_v58  ;;  %293 = vst [vmem:[%s708_s24 + $0x1d8] sm:$0xff] %v197_v59  ;;  %v198_v60 = vld [vmem:[%s699_s29 + $0x1e0] sm:$0xff]  ;;  %v199_v61 = vld [vmem:[%s699_s29 + $0x1e8] sm:$0xff] }
  0x57   : > { %v200_v62 = vld [vmem:[%s699_s29 + $0x1f0] sm:$0xff]  ;;  %294 = vst [vmem:[%s708_s24 + $0x1e0] sm:$0xff] %v198_v60  ;;  %295 = vst [vmem:[%s708_s24 + $0x1e8] sm:$0xff] %v199_v61  ;;  %v201_v63 = vld [vmem:[%s699_s29 + $0x1f8] sm:$0xff] }
  0x58   : > { %296 = vst [vmem:[%s708_s24 + $0x1f0] sm:$0xff] %v200_v62  ;;  %v202_v0 = vld [vmem:[%s699_s29 + $0x200] sm:$0xff]  ;;  %v203_v1 = vld [vmem:[%s699_s29 + $0x208] sm:$0xff]  ;;  %297 = vst [vmem:[%s708_s24 + $0x1f8] sm:$0xff] %v201_v63 }
  0x59   : > { %298 = vst [vmem:[%s708_s24 + $0x200] sm:$0xff] %v202_v0  ;;  %299 = vst [vmem:[%s708_s24 + $0x208] sm:$0xff] %v203_v1  ;;  %v204_v2 = vld [vmem:[%s699_s29 + $0x210] sm:$0xff]  ;;  %v205_v3 = vld [vmem:[%s699_s29 + $0x218] sm:$0xff] }
  0x5a   : > { %v206_v4 = vld [vmem:[%s699_s29 + $0x220] sm:$0xff]  ;;  %300 = vst [vmem:[%s708_s24 + $0x210] sm:$0xff] %v204_v2  ;;  %301 = vst [vmem:[%s708_s24 + $0x218] sm:$0xff] %v205_v3  ;;  %v207_v5 = vld [vmem:[%s699_s29 + $0x228] sm:$0xff] }
  0x5b   : > { %302 = vst [vmem:[%s708_s24 + $0x220] sm:$0xff] %v206_v4  ;;  %v208_v6 = vld [vmem:[%s699_s29 + $0x230] sm:$0xff]  ;;  %v209_v7 = vld [vmem:[%s699_s29 + $0x238] sm:$0xff]  ;;  %303 = vst [vmem:[%s708_s24 + $0x228] sm:$0xff] %v207_v5 }
  0x5c   : > { %304 = vst [vmem:[%s708_s24 + $0x230] sm:$0xff] %v208_v6  ;;  %305 = vst [vmem:[%s708_s24 + $0x238] sm:$0xff] %v209_v7  ;;  %v210_v8 = vld [vmem:[%s699_s29 + $0x240] sm:$0xff]  ;;  %v211_v9 = vld [vmem:[%s699_s29 + $0x248] sm:$0xff] }
  0x5d   : > { %v212_v10 = vld [vmem:[%s699_s29 + $0x250] sm:$0xff]  ;;  %306 = vst [vmem:[%s708_s24 + $0x240] sm:$0xff] %v210_v8  ;;  %307 = vst [vmem:[%s708_s24 + $0x248] sm:$0xff] %v211_v9  ;;  %v213_v11 = vld [vmem:[%s699_s29 + $0x258] sm:$0xff] }
  0x5e   : > { %308 = vst [vmem:[%s708_s24 + $0x250] sm:$0xff] %v212_v10  ;;  %v214_v12 = vld [vmem:[%s699_s29 + $0x260] sm:$0xff]  ;;  %v215_v13 = vld [vmem:[%s699_s29 + $0x268] sm:$0xff]  ;;  %309 = vst [vmem:[%s708_s24 + $0x258] sm:$0xff] %v213_v11 }
  0x5f   : > { %310 = vst [vmem:[%s708_s24 + $0x260] sm:$0xff] %v214_v12  ;;  %311 = vst [vmem:[%s708_s24 + $0x268] sm:$0xff] %v215_v13  ;;  %v216_v14 = vld [vmem:[%s699_s29 + $0x270] sm:$0xff]  ;;  %v217_v15 = vld [vmem:[%s699_s29 + $0x278] sm:$0xff] }
  0x60   : > { %v218_v16 = vld [vmem:[%s699_s29 + $0x280] sm:$0xff]  ;;  %312 = vst [vmem:[%s708_s24 + $0x270] sm:$0xff] %v216_v14  ;;  %313 = vst [vmem:[%s708_s24 + $0x278] sm:$0xff] %v217_v15  ;;  %v219_v17 = vld [vmem:[%s699_s29 + $0x288] sm:$0xff] }
  0x61   : > { %314 = vst [vmem:[%s708_s24 + $0x280] sm:$0xff] %v218_v16  ;;  %v220_v18 = vld [vmem:[%s699_s29 + $0x290] sm:$0xff]  ;;  %v221_v19 = vld [vmem:[%s699_s29 + $0x298] sm:$0xff]  ;;  %315 = vst [vmem:[%s708_s24 + $0x288] sm:$0xff] %v219_v17 }
  0x62   : > { %316 = vst [vmem:[%s708_s24 + $0x290] sm:$0xff] %v220_v18  ;;  %317 = vst [vmem:[%s708_s24 + $0x298] sm:$0xff] %v221_v19  ;;  %v222_v20 = vld [vmem:[%s699_s29 + $0x2a0] sm:$0xff]  ;;  %v223_v21 = vld [vmem:[%s699_s29 + $0x2a8] sm:$0xff] }
  0x63   : > { %v224_v22 = vld [vmem:[%s699_s29 + $0x2b0] sm:$0xff]  ;;  %318 = vst [vmem:[%s708_s24 + $0x2a0] sm:$0xff] %v222_v20  ;;  %319 = vst [vmem:[%s708_s24 + $0x2a8] sm:$0xff] %v223_v21  ;;  %v225_v23 = vld [vmem:[%s699_s29 + $0x2b8] sm:$0xff] }
  0x64   : > { %320 = vst [vmem:[%s708_s24 + $0x2b0] sm:$0xff] %v224_v22  ;;  %v226_v24 = vld [vmem:[%s699_s29 + $0x2c0] sm:$0xff]  ;;  %v227_v25 = vld [vmem:[%s699_s29 + $0x2c8] sm:$0xff]  ;;  %321 = vst [vmem:[%s708_s24 + $0x2b8] sm:$0xff] %v225_v23 }
  0x65   : > { %322 = vst [vmem:[%s708_s24 + $0x2c0] sm:$0xff] %v226_v24  ;;  %323 = vst [vmem:[%s708_s24 + $0x2c8] sm:$0xff] %v227_v25  ;;  %v228_v26 = vld [vmem:[%s699_s29 + $0x2d0] sm:$0xff]  ;;  %v229_v27 = vld [vmem:[%s699_s29 + $0x2d8] sm:$0xff] }
  0x66   : > { %v230_v28 = vld [vmem:[%s699_s29 + $0x2e0] sm:$0xff]  ;;  %324 = vst [vmem:[%s708_s24 + $0x2d0] sm:$0xff] %v228_v26  ;;  %325 = vst [vmem:[%s708_s24 + $0x2d8] sm:$0xff] %v229_v27  ;;  %v231_v29 = vld [vmem:[%s699_s29 + $0x2e8] sm:$0xff] }
  0x67   : > { %326 = vst [vmem:[%s708_s24 + $0x2e0] sm:$0xff] %v230_v28  ;;  %v232_v30 = vld [vmem:[%s699_s29 + $0x2f0] sm:$0xff]  ;;  %v233_v31 = vld [vmem:[%s699_s29 + $0x2f8] sm:$0xff]  ;;  %327 = vst [vmem:[%s708_s24 + $0x2e8] sm:$0xff] %v231_v29 }
  0x68   : > { %328 = vst [vmem:[%s708_s24 + $0x2f0] sm:$0xff] %v232_v30  ;;  %329 = vst [vmem:[%s708_s24 + $0x2f8] sm:$0xff] %v233_v31 }
  0x69   : > { %527 = shalt.err (!%p524_p1)
}
  0x6a   : > { %s528_s11 = scalar_lea.hbm %s897_s28, 12288  ;;  %s532_s19 = scalar_lea.hbm %s950_s1, 36864 }
  0x6b   : > { %p529_p3 = scmp.ne.s32.totalorder %s897_s28, %s528_s11  ;;  %p533_p0 = scmp.lt.u32.totalorder %s897_s28, %s950_s1 }
  0x6c   : > { %p534_p2 = scmp.lt.u32.totalorder %s532_s19, %s528_s11  ;;  %p536_p6 = scmp.lt.u32.totalorder %s528_s11, %s897_s28 }
  0x6d   : > { %p530_p4 = pnand %p529_p3, %p956_p10 }
  0x6e   : > { %p535_p7 = por %p534_p2, %p533_p0 }
  0x6f   : > { %p531_p5 = pneg %p530_p4 }
  0x70   : > { %p537_p11 = por %p536_p6, %p535_p7 }
  0x72   : > { %p538_p12 = pnand %p537_p11, %p531_p5 }
  0x74   : > { %541 = shalt.err (!%p538_p12)
}
  0x75   : > { %s586_s23 = smov 768   ;;  %s587_s26 = smov 48  }
  0x76   : > { %436 = dma.vmem_to_hbm [thread:$0]  (%p956_p10), %s886_s25, 12288, %s897_s28, %s331_s30, %s586_s23, %s586_s23, %s587_s26  }
  0x77 PF: > { %p447_p8 = scmp.ge.s32.totalorder %s580_s9, 2  ;;  %s360_s29 = sand.u32 1, %s568_s6  }
  0x78   : > { %p957_p9 = scmp.ne.s32.totalorder %s954_s18, 0  ;;  %s361_s24 = scalar_lea.sflag [#allocation4], %s360_s29 }
  0x7a   : > { %p443_p13 = pnand %p447_p8, %p957_p9 }
  0x7c   : > { %563 = dma.done.wait (!%p443_p13), %s361_s24, 12288  }
  0x7d   : > { %565 = vsyncadd (!%p443_p13), %s361_s24, 4294955008  ;;  %p14_p1 = scmp.ge.s32.totalorder %s623_s12, 5   ;;  %s958_s6 = smov %s572_s7 }
  0x7e   : > { %s959_s7 = smov %s576_s8  ;;  %s960_s8 = smov %s635_s15 }
  0x7f   : > { %s961_s9 = smov %s623_s12  ;;  %16 = sbr.rel (!%p14_p1) target bundleno = 5 (0x5), region = 69 }
  0x86   :  { %366 = vsyncpa [#allocation3], 1 }
  0x87   :  { %368 = vsyncpa [#allocation3 + $0x1], 1 }
  0x88   :  { %369 = vsyncpa [#allocation4], 1 }
  0x89   :  { %371 = vsyncpa [#allocation4 + $0x1], 1 }

</bundles_post_ra>
